<compile_context>
chip_gen: v7x
topology: tpu7x:2x2x1
jax: 0.10.0
libtpu: 0.0.40
codegen_flags: <defaults>
</compile_context>

<pallas_src>
import jax
import jax.numpy as jnp
from jax.experimental import pallas as pl
from jax.experimental.pallas import tpu as pltpu


def _round_up(x, m):
    return (x + m - 1) // m * m


# ----------------------------------------------------------------------------
# Kernel A (fused, full vocab resident):  y = softmax(x @ W + b, axis=-1)
# ----------------------------------------------------------------------------
def _linear_softmax_fused_kernel(x_ref, w_ref, b_ref, o_ref):
    # x_ref: (tm, D) bf16   w_ref: (D, V) bf16   b_ref: (1, V) f32   o_ref: (tm, V)
    logits = jnp.dot(x_ref[...], w_ref[...],
                     preferred_element_type=jnp.float32)
    logits = logits + b_ref[...]                       # broadcast (1, V)
    m = jnp.max(logits, axis=-1, keepdims=True)        # stable softmax (f32)
    e = jnp.exp(logits - m)
    s = jnp.sum(e, axis=-1, keepdims=True)
    r = pl.reciprocal(s, approx=True)                  # EUP slot, off VPU path
    r = r * (2.0 - s * r)                              # Newton refinements
    r = r * (2.0 - s * r)
    o_ref[...] = (e * r).astype(o_ref.dtype)


# ----------------------------------------------------------------------------
# Kernels B (large-vocab, V-tiled two-pass):
#   pass 1: online row logsumexp over vocab tiles
#   pass 2: probs = exp(logits - lse) per (row, vocab) tile
# ----------------------------------------------------------------------------
def _lse_kernel(x_ref, w_ref, b_ref, lse_ref, m_sc, l_sc):
    j = pl.program_id(1)

    @pl.when(j == 0)
    def _():
        m_sc[...] = jnp.full(m_sc.shape, -jnp.inf, m_sc.dtype)
        l_sc[...] = jnp.zeros(l_sc.shape, l_sc.dtype)

    logits = jnp.dot(x_ref[...], w_ref[...],
                     preferred_element_type=jnp.float32)
    logits = logits + b_ref[...]
    m_blk = jnp.max(logits, axis=-1, keepdims=True)
    m_new = jnp.maximum(m_sc[...], m_blk)
    l_sc[...] = (l_sc[...] * jnp.exp(m_sc[...] - m_new)
                 + jnp.sum(jnp.exp(logits - m_new), axis=-1, keepdims=True))
    m_sc[...] = m_new

    @pl.when(j == pl.num_programs(1) - 1)
    def _():
        lse_ref[...] = m_sc[...] + jnp.log(l_sc[...])


def _prob_kernel(x_ref, w_ref, b_ref, lse_ref, o_ref):
    logits = jnp.dot(x_ref[...], w_ref[...],
                     preferred_element_type=jnp.float32)
    logits = logits + b_ref[...]
    o_ref[...] = jnp.exp(logits - lse_ref[...]).astype(o_ref.dtype)


# ----------------------------------------------------------------------------
# Wrapper: softmax(x @ W + b) over the vocab axis
# ----------------------------------------------------------------------------
def linear_softmax(x_bsd, weight, bias, *, max_rows=256, max_cols=4096,
                   out_dtype=jnp.float32):
    """x_bsd: (B,S,D); weight: (D,V) (transposed vs torch nn.Linear); bias: (V,).

    max_rows: row tile (MXU-native 256 for v6e/v7x; prefer 128 on v5e).
    max_cols: largest vocab block kept VMEM-resident; above it the V-tiled
              two-pass (online softmax) path is used.
    """
    B, S, D = x_bsd.shape
    V = weight.shape[1]
    M = B * S

    # Row tile: multiple of 16 (bf16 sublane tiling), pad rows rather than assert.
    tm = min(max_rows, _round_up(M, 16))
    Mp = _round_up(M, tm)

    x2d = x_bsd.reshape(M, D).astype(jnp.bfloat16)
    if Mp != M:
        x2d = jnp.pad(x2d, ((0, Mp - M), (0, 0)))
    w_bf16 = weight.astype(jnp.bfloat16)
    b2d = bias.reshape(1, V).astype(jnp.float32)
    n_rows = Mp // tm

    # Vocab tile for the two-pass path: largest multiple of 128 dividing V that
    # is <= max_cols. None -> keep the whole vocab resident (fused path).
    tv = None
    if V % 128 == 0 and V > max_cols:
        c = max_cols - (max_cols % 128)
        while c >= 128 and V % c != 0:
            c -= 128
        if c >= 128:
            tv = c

    if tv is None:
        # Fused path: full (D, V) weight + (tm, V) output resident in VMEM.
        fused_bytes = 2 * (tm * D * 2 + D * V * 2 + V * 4 + tm * V * 4)
        vmem_limit = int(min(96 << 20, max(32 << 20, 2 * fused_bytes)))
        out2d = pl.pallas_call(
            _linear_softmax_fused_kernel,
            out_shape=jax.ShapeDtypeStruct((Mp, V), out_dtype),
            grid_spec=pltpu.PrefetchScalarGridSpec(
                num_scalar_prefetch=0,
                grid=(n_rows,),
                in_specs=[
                    pl.BlockSpec((tm, D), lambda i: (i, 0)),
                    pl.BlockSpec((D, V), lambda i: (0, 0)),
                    pl.BlockSpec((1, V), lambda i: (0, 0)),
                ],
                out_specs=pl.BlockSpec((tm, V), lambda i: (i, 0)),
            ),
            compiler_params=pltpu.CompilerParams(
                dimension_semantics=("parallel",),
                vmem_limit_bytes=vmem_limit),
        )(x2d, w_bf16, b2d)
    else:
        # V-tiled two-pass path: weight streamed in (D, tv) blocks, bias indexed
        # per block; rows "parallel" (leading), vocab "arbitrary" (last).
        n_cols = V // tv
        tile_bytes = (2 * (tm * D * 2 + D * tv * 2 + tv * 4 + tm * tv * 4)
                      + 4 * tm * 4)
        vmem_limit = int(min(96 << 20, max(32 << 20, 2 * tile_bytes)))
        common = dict(compiler_params=pltpu.CompilerParams(
            dimension_semantics=("parallel", "arbitrary"),
            vmem_limit_bytes=vmem_limit))

        lse = pl.pallas_call(
            _lse_kernel,
            out_shape=jax.ShapeDtypeStruct((Mp, 1), jnp.float32),
            grid_spec=pltpu.PrefetchScalarGridSpec(
                num_scalar_prefetch=0,
                grid=(n_rows, n_cols),
                in_specs=[
                    pl.BlockSpec((tm, D), lambda i, j: (i, 0)),
                    pl.BlockSpec((D, tv), lambda i, j: (0, j)),
                    pl.BlockSpec((1, tv), lambda i, j: (0, j)),
                ],
                out_specs=pl.BlockSpec((tm, 1), lambda i, j: (i, 0)),
                scratch_shapes=[pltpu.VMEM((tm, 1), jnp.float32),
                                pltpu.VMEM((tm, 1), jnp.float32)],
            ),
            **common,
        )(x2d, w_bf16, b2d)

        out2d = pl.pallas_call(
            _prob_kernel,
            out_shape=jax.ShapeDtypeStruct((Mp, V), out_dtype),
            grid_spec=pltpu.PrefetchScalarGridSpec(
                num_scalar_prefetch=0,
                grid=(n_rows, n_cols),
                in_specs=[
                    pl.BlockSpec((tm, D), lambda i, j: (i, 0)),
                    pl.BlockSpec((D, tv), lambda i, j: (0, j)),
                    pl.BlockSpec((1, tv), lambda i, j: (0, j)),
                    pl.BlockSpec((tm, 1), lambda i, j: (i, 0)),
                ],
                out_specs=pl.BlockSpec((tm, tv), lambda i, j: (i, j)),
            ),
            **common,
        )(x2d, w_bf16, b2d, lse)

    if Mp != M:
        out2d = out2d[:M]
    return out2d.reshape(B, S, V)


# ----------------------------------------------------------------------------
# Deterministic stand-in for the injected transformer modules (plain JAX glue).
# Contract: transformer(src_tokens, tgt_tokens, pad_idx, eos_idx)
#           -> (batch, tgt_seq_len, d_model)
# ----------------------------------------------------------------------------
def make_transformer_stub(embed_table):
    def transformer(src_tokens, tgt_tokens, pad_idx, eos_idx):
        del eos_idx
        src_emb = embed_table[src_tokens]                       # (B, Ss, D)
        tgt_emb = embed_table[tgt_tokens]                       # (B, St, D)
        src_mask = (src_tokens != pad_idx)[..., None].astype(jnp.float32)
        ctx = jnp.sum(src_emb * src_mask, axis=1, keepdims=True) / (
            jnp.sum(src_mask, axis=1, keepdims=True) + 1e-6)    # (B, 1, D)
        return tgt_emb + ctx
    return transformer


# ----------------------------------------------------------------------------
# ProposedModel.forward — whole forward under one jax.jit
# ----------------------------------------------------------------------------
def make_forward(transformer1, transformer2):
    @jax.jit
    def forward(params, lan1, lan2, pad_idx, eos_idx):
        w1, b1 = params["lan1_linear"]
        w2, b2 = params["lan2_linear"]
        # The reference calls transformer1(lan1, lan2) twice and
        # transformer2(lan2, lan1) twice with identical args and identical
        # linear heads -> the duplicated outputs are bit-identical, so each
        # projection+softmax is computed once and returned twice.
        t1_out = transformer1(lan1, lan2, pad_idx, eos_idx)   # (B, lan2_seq, D)
        t2_out = transformer2(lan2, lan1, pad_idx, eos_idx)   # (B, lan1_seq, D)
        p_t1_w2 = linear_softmax(t1_out, w2, b2)  # start_lan1_inter / start_lan2_output
        p_t2_w1 = linear_softmax(t2_out, w1, b1)  # start_lan1_output / start_lan2_inter
        return (p_t1_w2, p_t2_w1, p_t2_w1, p_t1_w2)
    return forward


# ----------------------------------------------------------------------------
# Main
# ----------------------------------------------------------------------------
if __name__ == "__main__":
    batch = 2
    lan1_seq_len = 8
    lan2_seq_len = 8
    d_model = 32
    vocab_size = 256
    pad_idx = 0
    eos_idx = 2

    key = jax.random.PRNGKey(0)
    k_emb, k_w1, k_b1, k_w2, k_b2, k_t1, k_t2 = jax.random.split(key, 7)

    bound = 1.0 / (d_model ** 0.5)
    embed_table = jax.random.normal(k_emb, (vocab_size, d_model),
                                    dtype=jnp.float32) * 0.02
    params = {
        "lan1_linear": (
            jax.random.uniform(k_w1, (d_model, vocab_size), jnp.float32,
                               -bound, bound),
            jax.random.uniform(k_b1, (vocab_size,), jnp.float32, -bound, bound),
        ),
        "lan2_linear": (
            jax.random.uniform(k_w2, (d_model, vocab_size), jnp.float32,
                               -bound, bound),
            jax.random.uniform(k_b2, (vocab_size,), jnp.float32, -bound, bound),
        ),
    }

    transformer1 = make_transformer_stub(embed_table)
    transformer2 = make_transformer_stub(embed_table)
    forward = make_forward(transformer1, transformer2)

    lan1 = jax.random.randint(k_t1, (batch, lan1_seq_len), 0, vocab_size,
                              dtype=jnp.int32)
    lan2 = jax.random.randint(k_t2, (batch, lan2_seq_len), 0, vocab_size,
                              dtype=jnp.int32)

    outs = forward(params, lan1, lan2, pad_idx, eos_idx)
    outs = jax.block_until_ready(outs)

    # Shape + softmax-normalization sanity checks.
    assert outs[0].shape == (batch, lan2_seq_len, vocab_size)
    assert outs[1].shape == (batch, lan1_seq_len, vocab_size)
    assert outs[2].shape == (batch, lan1_seq_len, vocab_size)
    assert outs[3].shape == (batch, lan2_seq_len, vocab_size)
    for o in outs:
        s = jnp.sum(o, axis=-1)
        assert bool(jnp.all(jnp.abs(s - 1.0) < 1e-4)), "softmax not normalized"

    # Cross-check both kernel paths (fused full-V and V-tiled two-pass online
    # softmax) against a plain-JAX reference on the toy shapes.
    w2, b2 = params["lan2_linear"]
    t1_out = transformer1(lan1, lan2, pad_idx, eos_idx)
    ref = jax.nn.softmax(
        jnp.dot(t1_out.astype(jnp.bfloat16), w2.astype(jnp.bfloat16),
                preferred_element_type=jnp.float32) + b2, axis=-1)
    fused = linear_softmax(t1_out, w2, b2)                 # fused path
    tiled = linear_softmax(t1_out, w2, b2, max_cols=128)   # forces V-tiled path
    fused, tiled, ref = jax.block_until_ready((fused, tiled, ref))
    assert bool(jnp.all(jnp.abs(fused - ref) < 1e-4)), "fused path mismatch"
    assert bool(jnp.all(jnp.abs(tiled - ref) < 1e-4)), "tiled path mismatch"

    print("KERNEL_OK")
</pallas_src>

<mosaic_0001>
module attributes {stable_mosaic.version = 11 : i64} {
  func.func @_linear_softmax_fused_kernel(%arg0: i32, %arg1: memref<16x32xbf16, #tpu.memory_space<vmem>>, %arg2: memref<32x256xbf16, #tpu.memory_space<vmem>>, %arg3: memref<1x256xf32, #tpu.memory_space<vmem>>, %arg4: memref<16x256xf32, #tpu.memory_space<vmem>>) attributes {dimension_semantics = [#tpu.dimension_semantics<parallel>], iteration_bounds = array<i64: 1>, scalar_prefetch = 0 : i64, scratch_operands = 0 : i64, tpu.core_type = #tpu.core_type<tc>, window_params = [{transform_indices = @transform_0, window_bounds = array<i64: 16, 32>}, {pipeline_mode = #tpu.pipeline_mode<synchronous>, transform_indices = @transform_1, window_bounds = array<i64: 32, 256>}, {pipeline_mode = #tpu.pipeline_mode<synchronous>, transform_indices = @transform_2, window_bounds = array<i64: 1, 256>}, {transform_indices = @transform_3, window_bounds = array<i64: 16, 256>}]} {
    %c0 = arith.constant 0 : index
    %c0_0 = arith.constant 0 : index
    %0 = vector.load %arg1[%c0, %c0_0] : memref<16x32xbf16, #tpu.memory_space<vmem>>, vector<16x32xbf16>
    %c0_1 = arith.constant 0 : index
    %c0_2 = arith.constant 0 : index
    %1 = vector.load %arg2[%c0_1, %c0_2] : memref<32x256xbf16, #tpu.memory_space<vmem>>, vector<32x256xbf16>
    %cst = arith.constant dense<0.000000e+00> : vector<16x256xf32>
    %2 = tpu.matmul %0, %1, %cst {dimension_numbers = #tpu.dot_dimension_numbers<[1], [0], [0], [1], [0, 0, 1, 1], [], []>} : vector<16x32xbf16>, vector<32x256xbf16>, vector<16x256xf32> -> vector<16x256xf32>
    %c0_3 = arith.constant 0 : index
    %c0_4 = arith.constant 0 : index
    %3 = vector.load %arg3[%c0_3, %c0_4] : memref<1x256xf32, #tpu.memory_space<vmem>>, vector<1x256xf32>
    %4 = vector.broadcast %3 : vector<1x256xf32> to vector<16x256xf32>
    %5 = arith.addf %2, %4 : vector<16x256xf32>
    %cst_5 = arith.constant dense<0xFF800000> : vector<16xf32>
    %6 = vector.multi_reduction <maximumf>, %5, %cst_5 [1] : vector<16x256xf32> to vector<16xf32>
    %7 = vector.shape_cast %6 : vector<16xf32> to vector<16x1xf32>
    %8 = vector.broadcast %7 : vector<16x1xf32> to vector<16x256xf32>
    %9 = arith.subf %5, %8 : vector<16x256xf32>
    %10 = math.exp %9 : vector<16x256xf32>
    %cst_6 = arith.constant dense<0.000000e+00> : vector<16xf32>
    %11 = vector.multi_reduction <add>, %10, %cst_6 [1] : vector<16x256xf32> to vector<16xf32>
    %12 = vector.shape_cast %11 : vector<16xf32> to vector<16x1xf32>
    %13 = tpu.reciprocal %12 {approx = true} : vector<16x1xf32> -> vector<16x1xf32>
    %14 = arith.mulf %12, %13 : vector<16x1xf32>
    %cst_7 = arith.constant 2.000000e+00 : f32
    %15 = vector.broadcast %cst_7 : f32 to vector<16x1xf32>
    %16 = arith.subf %15, %14 : vector<16x1xf32>
    %17 = arith.mulf %13, %16 : vector<16x1xf32>
    %18 = arith.mulf %12, %17 : vector<16x1xf32>
    %cst_8 = arith.constant 2.000000e+00 : f32
    %19 = vector.broadcast %cst_8 : f32 to vector<16x1xf32>
    %20 = arith.subf %19, %18 : vector<16x1xf32>
    %21 = arith.mulf %17, %20 : vector<16x1xf32>
    %22 = vector.broadcast %21 : vector<16x1xf32> to vector<16x256xf32>
    %23 = arith.mulf %10, %22 : vector<16x256xf32>
    %c0_9 = arith.constant 0 : index
    %c0_10 = arith.constant 0 : index
    %24 = vector.load %arg4[%c0_9, %c0_10] : memref<16x256xf32, #tpu.memory_space<vmem>>, vector<16x256xf32>
    tpu.vector_store %arg4[%c0_9, %c0_10], %23 {strides = array<i32>} : memref<16x256xf32, #tpu.memory_space<vmem>>, vector<16x256xf32>,
    return
  }
  func.func @transform_0(%arg0: i32) -> (i32, i32) {
    %c0_i32 = arith.constant 0 : i32
    %c0_i32_0 = arith.constant 0 : i32
    return %arg0, %c0_i32 : i32, i32
  }
  func.func @transform_1(%arg0: i32) -> (i32, i32) {
    %c0_i32 = arith.constant 0 : i32
    %c0_i32_0 = arith.constant 0 : i32
    %c0_i32_1 = arith.constant 0 : i32
    return %c0_i32, %c0_i32_0 : i32, i32
  }
  func.func @transform_2(%arg0: i32) -> (i32, i32) {
    %c0_i32 = arith.constant 0 : i32
    %c0_i32_0 = arith.constant 0 : i32
    %c0_i32_1 = arith.constant 0 : i32
    return %c0_i32, %c0_i32_0 : i32, i32
  }
  func.func @transform_3(%arg0: i32) -> (i32, i32) {
    %c0_i32 = arith.constant 0 : i32
    %c0_i32_0 = arith.constant 0 : i32
    return %arg0, %c0_i32 : i32, i32
  }
}

</mosaic_0001>

<bundles_post_ra>
// kernel: forward.2
= control target key start
LH: loop header
LB: loop body
LE: loop exit
PB: predicated region body
PF: predicated region fallthrough
CT: control target
= control target key end

     0   :  { %v181_v1 = vmov 0   ;;  %vm58_vm0 = vcmask 261120   ;;  %v23_v6 = vlaneseq  ;;  %s232_s1 = inlined_call_operand.vmem [shape: bf16[32,256], index: 1, kind: input, shape index: {}]   ;;  %s233_s0 = inlined_call_operand.vmem [shape: bf16[16,32], index: 0, kind: input, shape index: {}]   ;;  %s234_s2 = inlined_call_operand.vmem [shape: f32[1,256], index: 2, kind: input, shape index: {}]   ;;  %s235_s3 = inlined_call_operand.vmem [shape: f32[16,256], index: 3, kind: output, shape index: {}]  }
   0x1   :  { %v162_v0 = vld [vmem:[%s232_s1 + $0x4] ss:$8 sps:$4 sm:$0xff]   ;;  %94 = vmatprep.mubr.bf16.mxu0 %v181_v1  ;;  %v164_v2 = vld [vmem:[%s232_s1] ss:$8 sps:$4 sm:$0xff]   ;;  %v165_v3 = vld [vmem:[%s232_s1 + $0x14] ss:$8 sps:$4 sm:$0xff]  }
   0x2   :  { %62 = vmatprep.subr.bf16.mxu0 %v162_v0  ;;  %v167_v4 = vld [vmem:[%s232_s1 + $0x10] ss:$8 sps:$4 sm:$0xff]   ;;  %v168_v5 = vld [vmem:[%s233_s0] sm:$0xff]   ;;  %v24_v7 = vshrl.u32 %v23_v6, 7 }
   0x3   :  { %63 = vmatpush1.bf16.msra.mxu0 %v164_v2  ;;  %v21_v9 = vld [vmem:[%s234_s2] sm:$0x3] }
   0x4   :  { %64 = vmatprep.subr.bf16.mxu0 %v165_v3  ;;  %v25_v8 = vsub.s32 0, %v24_v7  ;;  %v29_v10 = vsub.s32 1, %v24_v7 }
   0x6   :  { %v26_v11 = vrot.slane %v21_v9, %v25_v8  ;;  %v30_v12 = vrot.slane %v21_v9, %v29_v10 }
   0x7   :  { %65 = vmatpush1.bf16.msra.mxu0 %v167_v4 }
   0xa   :  { %160 = vmatmul.mubr.msk.bf16.vlgmr.msra.gmra.mrb[0].mxu0 %vm58_vm0, %v168_v5 }
  0xdd   :  { %v96_v13 = vpop.f32.mrb[0].mxu0 }
  0xde   :  { %v97_v14 = vadd.f32 %v96_v13, %v26_v11  ;;  %v98_v15 = vpop.f32.mrb[1].mxu0 }
  0xdf   :  { %v99_v16 = vadd.f32 %v98_v15, %v30_v12  ;;  %v100_v17 = vpop.f32.mrb[2].mxu0 }
  0xe0   :  { %v102_v18 = vpop.f32.mrb[3].mxu0  ;;  %v101_v19 = vadd.f32 %v100_v17, %v26_v11 }
  0xe1   :  { %v103_v20 = vadd.f32 %v102_v18, %v30_v12  ;;  %v105_v21 = vmax.f32 %v97_v14, %v99_v16 }
  0xe3   :  { %106 = vmax.xlane.f32.xlu0 %v105_v21  ;;  %v108_v22 = vmax.f32 %v101_v19, %v103_v20 }
  0xe7   :  { %109 = vmax.xlane.f32.xlu0 %v108_v22 }
 0x170   :  { %v107_v23 = vpop.xlane.xlu0 %106 }
 0x171   :  { %v111_v24 = vsub.f32 %v97_v14, %v107_v23  ;;  %v112_v25 = vsub.f32 %v99_v16, %v107_v23 }
 0x173   :  { %v115_v26 = vmul.f32 1.442695, %v111_v24  ;;  %v117_v27 = vmul.f32 1.442695, %v112_v25 }
 0x174   :  { %v110_v28 = vpop.xlane.xlu0 %109 }
 0x175   :  { %169 = vpow2.f32 %v115_v26  ;;  %v113_v29 = vsub.f32 %v101_v19, %v110_v28  ;;  %v114_v30 = vsub.f32 %v103_v20, %v110_v28 }
 0x176   :  { %171 = vpow2.f32 %v117_v27 }
 0x177   :  { %v119_v31 = vmul.f32 1.442695, %v113_v29  ;;  %v121_v32 = vmul.f32 1.442695, %v114_v30 }
 0x179   :  { %173 = vpow2.f32 %v119_v31 }
 0x17a   :  { %175 = vpow2.f32 %v121_v32 }
 0x17f   :  { %v170_v33 = vpop.eup %169 }
 0x180   :  { %v172_v34 = vpop.eup %171 }
 0x181   :  { %v123_v35 = vadd.f32 %v172_v34, %v170_v33 }
 0x183   :  { %v174_v36 = vpop.eup %173  ;;  %124 = vadd.xlane.f32.xlu1 %v123_v35 }
 0x184   :  { %v176_v37 = vpop.eup %175 }
 0x185   :  { %v126_v38 = vadd.f32 %v176_v37, %v174_v36 }
 0x187   :  { %127 = vadd.xlane.f32.xlu1 %v126_v38 }
 0x210   :  { %v125_v39 = vpop.xlane.xlu1 %124 }
 0x211   :  { %177 = vrcp.f32 %v125_v39 }
 0x214   :  { %v128_v40 = vpop.xlane.xlu1 %127 }
 0x215   :  { %179 = vrcp.f32 %v128_v40 }
 0x21b   :  { %v178_v41 = vpop.eup %177 }
 0x21c   :  { %v131_v42 = vmul.f32 %v178_v41, %v125_v39 }
 0x21e   :  { %v133_v43 = vsub.f32 2.0, %v131_v42 }
 0x21f   :  { %v180_v44 = vpop.eup %179 }
 0x220   :  { %v135_v45 = vmul.f32 %v178_v41, %v133_v43  ;;  %v132_v46 = vmul.f32 %v180_v44, %v128_v40 }
 0x222   :  { %v137_v47 = vmul.f32 %v135_v45, %v125_v39  ;;  %v134_v48 = vsub.f32 2.0, %v132_v46 }
 0x224   :  { %v139_v49 = vsub.f32 2.0, %v137_v47  ;;  %v136_v50 = vmul.f32 %v180_v44, %v134_v48 }
 0x226   :  { %v141_v51 = vmul.f32 %v139_v49, %v135_v45  ;;  %v138_v52 = vmul.f32 %v136_v50, %v128_v40 }
 0x228   :  { %v143_v53 = vmul.f32 %v170_v33, %v141_v51  ;;  %v144_v54 = vmul.f32 %v172_v34, %v141_v51  ;;  %v140_v55 = vsub.f32 2.0, %v138_v52 }
 0x22a   :  { %147 = vst [vmem:[%s235_s3] sm:$0xff] %v143_v53  ;;  %148 = vst [vmem:[%s235_s3 + $0x8] sm:$0xff] %v144_v54  ;;  %v142_v56 = vmul.f32 %v140_v55, %v136_v50 }
 0x22c   :  { %v145_v57 = vmul.f32 %v174_v36, %v142_v56  ;;  %v146_v58 = vmul.f32 %v176_v37, %v142_v56 }
 0x22e   :  { %149 = vst [vmem:[%s235_s3 + $0x10] sm:$0xff] %v145_v57  ;;  %150 = vst [vmem:[%s235_s3 + $0x18] sm:$0xff] %v146_v58 }

</bundles_post_ra>
